<compile_context>
chip_gen: v7x
topology: tpu7x:2x2x1
jax: 0.10.0
libtpu: 0.0.40
codegen_flags: <defaults>
</compile_context>

<pallas_src>
import functools

import jax
import jax.numpy as jnp
from jax.experimental import pallas as pl
from jax.experimental.pallas import tpu as pltpu

LANE = 128             # lane width (last dim)
ALIGN_ROWS = 16        # sublane alignment (safe for f32 and bf16 packing)
MAX_BLOCK_ROWS = 2048  # 2048 * 128 * 4B = 1 MiB per f32 stream per buffer


def _cdiv(a, b):
    return -(-a // b)


def _round_up(a, b):
    return _cdiv(a, b) * b


def _to_slab(x, rows_p):
    """Flatten to 1-D, zero-pad only if needed, view as (rows_p, LANE)."""
    flat = x.reshape(-1)
    pad = rows_p * LANE - flat.shape[0]
    if pad:
        flat = jnp.pad(flat, (0, pad))
    return flat.reshape(rows_p, LANE)


# ----------------------------- kernels ---------------------------------------


def _sum_kernel(p_ref, t_ref, o_ref):
    """Accumulate (pred - target)^2 into a resident (8, 128) output block."""
    @pl.when(pl.program_id(1) == 0)
    def _():
        o_ref[...] = jnp.zeros_like(o_ref)

    d = p_ref[...].astype(jnp.float32) - t_ref[...].astype(jnp.float32)
    # (block_rows, 128) -> (block_rows//8, 8, 128); axis-0 sum = pure VPU adds.
    o_ref[...] += jnp.sum((d * d).reshape(-1, 8, LANE), axis=0)


def _sum_kernel_w(p_ref, t_ref, w_ref, o_ref):
    """Accumulate weight * (pred - target)^2 into a resident (8, 128) block."""
    @pl.when(pl.program_id(1) == 0)
    def _():
        o_ref[...] = jnp.zeros_like(o_ref)

    d = p_ref[...].astype(jnp.float32) - t_ref[...].astype(jnp.float32)
    sq = d * d * w_ref[...].astype(jnp.float32)
    o_ref[...] += jnp.sum(sq.reshape(-1, 8, LANE), axis=0)


def _elem_kernel(p_ref, t_ref, o_ref, *, loss_weight):
    """loss_weight * (pred - target)^2, output in input dtype."""
    d = p_ref[...].astype(jnp.float32) - t_ref[...].astype(jnp.float32)
    o_ref[...] = (loss_weight * (d * d)).astype(o_ref.dtype)


def _elem_kernel_w(p_ref, t_ref, w_ref, o_ref, *, loss_weight):
    """loss_weight * weight * (pred - target)^2, output in input dtype."""
    d = p_ref[...].astype(jnp.float32) - t_ref[...].astype(jnp.float32)
    sq = loss_weight * (d * d) * w_ref[...].astype(jnp.float32)
    o_ref[...] = sq.astype(o_ref.dtype)


# ----------------------------- wrappers ---------------------------------------


def _pallas_sq_sum(pred, target, weight=None):
    """Returns sum(weight * (pred - target)^2) as an f32 scalar."""
    n = int(pred.size)
    rows = max(1, _cdiv(n, LANE))

    # Split the reduction into 2 partials (leading "parallel" axis) so a 2-TC
    # chip (v7x) can work on both halves; on 1-TC chips it runs sequentially.
    nsplit = 2 if rows > 2 * ALIGN_ROWS else 1
    per_split = _cdiv(rows, nsplit)
    block_rows = min(MAX_BLOCK_ROWS, _round_up(per_split, ALIGN_ROWS))
    inner = _cdiv(per_split, block_rows)
    rows_p = nsplit * inner * block_rows

    args = [_to_slab(pred, rows_p), _to_slab(target, rows_p)]
    if weight is not None:
        w = jnp.broadcast_to(weight, pred.shape)
        args.append(_to_slab(w, rows_p))
        kernel = _sum_kernel_w
    else:
        kernel = _sum_kernel

    in_spec = pl.BlockSpec((block_rows, LANE), lambda c, i: (c * inner + i, 0))
    partials = pl.pallas_call(
        kernel,
        out_shape=jax.ShapeDtypeStruct((nsplit * 8, LANE), jnp.float32),
        grid_spec=pltpu.PrefetchScalarGridSpec(
            num_scalar_prefetch=0,
            grid=(nsplit, inner),
            in_specs=[in_spec] * len(args),
            out_specs=pl.BlockSpec((8, LANE), lambda c, i: (c, 0)),
        ),
        compiler_params=pltpu.CompilerParams(
            dimension_semantics=("parallel", "arbitrary")),
    )(*args)
    # Tiny final reduce over (nsplit*8, 128) floats.
    return jnp.sum(partials)


def _pallas_sq_elem(pred, target, weight, loss_weight):
    """Returns loss_weight * weight * (pred - target)^2 elementwise."""
    orig_shape = pred.shape
    n = int(pred.size)
    rows = max(1, _cdiv(n, LANE))
    block_rows = min(MAX_BLOCK_ROWS, _round_up(rows, ALIGN_ROWS))
    inner = _cdiv(rows, block_rows)
    rows_p = inner * block_rows

    args = [_to_slab(pred, rows_p), _to_slab(target, rows_p)]
    if weight is not None:
        w = jnp.broadcast_to(weight, pred.shape)
        args.append(_to_slab(w, rows_p))
        kernel = functools.partial(_elem_kernel_w, loss_weight=loss_weight)
    else:
        kernel = functools.partial(_elem_kernel, loss_weight=loss_weight)

    spec = pl.BlockSpec((block_rows, LANE), lambda i: (i, 0))
    out2d = pl.pallas_call(
        kernel,
        out_shape=jax.ShapeDtypeStruct((rows_p, LANE), pred.dtype),
        grid_spec=pltpu.PrefetchScalarGridSpec(
            num_scalar_prefetch=0,
            grid=(inner,),
            in_specs=[spec] * len(args),
            out_specs=spec,
        ),
        compiler_params=pltpu.CompilerParams(
            dimension_semantics=("parallel",)),
    )(*args)

    flat = out2d.reshape(-1)
    if rows_p * LANE != n:
        flat = flat[:n]
    return flat.reshape(orig_shape)


class MSELoss:
    """JAX/Pallas port of the mmdet MSELoss module."""

    def __init__(self, reduction='mean', loss_weight=1.0):
        assert reduction in ('none', 'mean', 'sum')
        self.reduction = reduction
        self.loss_weight = float(loss_weight)

    def __call__(self, pred, target, weight=None, avg_factor=None):
        if self.reduction == 'none':
            # mmdet's weight_reduce_loss leaves the loss unreduced here
            # (avg_factor has no effect); loss_weight is fused into the kernel.
            return _pallas_sq_elem(pred, target, weight, self.loss_weight)

        total = _pallas_sq_sum(pred, target, weight)
        if self.reduction == 'sum':
            if avg_factor is not None:
                raise ValueError(
                    'avg_factor can not be used with reduction="sum"')
            loss = total
        else:  # 'mean'
            if avg_factor is not None:
                loss = total / jnp.asarray(avg_factor, jnp.float32)
            else:
                loss = total / jnp.float32(pred.size)
        return self.loss_weight * loss


# ----------------------------- demo / check -----------------------------------

if __name__ == "__main__":
    key = jax.random.PRNGKey(0)
    k1, k2, k3, k4, k5 = jax.random.split(key, 5)

    shape = (2, 4, 16, 16)  # NCHW-style input; kernel works on a flattened slab
    pred = jax.random.normal(k1, shape, dtype=jnp.float32)
    target = jax.random.normal(k2, shape, dtype=jnp.float32)
    weight = jax.random.uniform(k3, shape, dtype=jnp.float32)

    loss_mod = MSELoss(reduction='mean', loss_weight=1.0)

    # mean reduction, no weight (no-weight specialized kernel path)
    out_mean = jax.block_until_ready(loss_mod(pred, target))
    ref_mean = jnp.mean((pred - target) ** 2)
    assert jnp.allclose(out_mean, ref_mean, rtol=1e-5, atol=1e-5)

    # mean reduction with weight and avg_factor
    out_avg = jax.block_until_ready(
        loss_mod(pred, target, weight=weight, avg_factor=100.0))
    ref_avg = jnp.sum((pred - target) ** 2 * weight) / 100.0
    assert jnp.allclose(out_avg, ref_avg, rtol=1e-5, atol=1e-4)

    # sum reduction with loss_weight
    out_sum = jax.block_until_ready(
        MSELoss(reduction='sum', loss_weight=2.0)(pred, target))
    ref_sum = 2.0 * jnp.sum((pred - target) ** 2)
    assert jnp.allclose(out_sum, ref_sum, rtol=1e-5, atol=1e-3)

    # none reduction (elementwise, loss_weight fused in-kernel)
    out_none = jax.block_until_ready(
        MSELoss(reduction='none', loss_weight=0.5)(pred, target, weight=weight))
    ref_none = 0.5 * (pred - target) ** 2 * weight
    assert out_none.shape == shape
    assert jnp.allclose(out_none, ref_none, rtol=1e-5, atol=1e-6)

    # ragged (non-aligned) size to exercise the padded-tail path
    shape_odd = (3, 5, 7)
    p_odd = jax.random.normal(k4, shape_odd, dtype=jnp.float32)
    t_odd = jax.random.normal(k5, shape_odd, dtype=jnp.float32)
    out_odd = jax.block_until_ready(MSELoss(reduction='mean')(p_odd, t_odd))
    ref_odd = jnp.mean((p_odd - t_odd) ** 2)
    assert jnp.allclose(out_odd, ref_odd, rtol=1e-5, atol=1e-5)
    out_odd_none = jax.block_until_ready(MSELoss(reduction='none')(p_odd, t_odd))
    assert out_odd_none.shape == shape_odd
    assert jnp.allclose(out_odd_none, (p_odd - t_odd) ** 2, rtol=1e-5, atol=1e-6)

    print("KERNEL_OK")
</pallas_src>

<mosaic_0001>
module attributes {stable_mosaic.version = 11 : i64} {
  func.func @_sum_kernel(%arg0: i32, %arg1: i32, %arg2: memref<16x128xf32, #tpu.memory_space<vmem>>, %arg3: memref<16x128xf32, #tpu.memory_space<vmem>>, %arg4: memref<8x128xf32, #tpu.memory_space<vmem>>) attributes {dimension_semantics = [#tpu.dimension_semantics<parallel>, #tpu.dimension_semantics<arbitrary>], iteration_bounds = array<i64: 1, 1>, scalar_prefetch = 0 : i64, scratch_operands = 0 : i64, tpu.core_type = #tpu.core_type<tc>, window_params = [{transform_indices = @transform_0, window_bounds = array<i64: 16, 128>}, {transform_indices = @transform_1, window_bounds = array<i64: 16, 128>}, {transform_indices = @transform_2, window_bounds = array<i64: 8, 128>}]} {
    %c0_i32 = arith.constant 0 : i32
    %0 = arith.cmpi eq, %arg1, %c0_i32 : i32
    %1 = arith.extui %0 : i1 to i32
    %c0_i32_0 = arith.constant 0 : i32
    %2 = arith.cmpi ne, %1, %c0_i32_0 : i32
    scf.if %2 {
      %cst_8 = arith.constant 0.000000e+00 : f32
      %12 = vector.broadcast %cst_8 : f32 to vector<8x128xf32>
      %c0_9 = arith.constant 0 : index
      %c0_10 = arith.constant 0 : index
      %13 = vector.load %arg4[%c0_9, %c0_10] : memref<8x128xf32, #tpu.memory_space<vmem>>, vector<8x128xf32>
      tpu.vector_store %arg4[%c0_9, %c0_10], %12 {strides = array<i32>} : memref<8x128xf32, #tpu.memory_space<vmem>>, vector<8x128xf32>,
    } else {
    }
    %c0 = arith.constant 0 : index
    %c0_1 = arith.constant 0 : index
    %3 = vector.load %arg2[%c0, %c0_1] : memref<16x128xf32, #tpu.memory_space<vmem>>, vector<16x128xf32>
    %c0_2 = arith.constant 0 : index
    %c0_3 = arith.constant 0 : index
    %4 = vector.load %arg3[%c0_2, %c0_3] : memref<16x128xf32, #tpu.memory_space<vmem>>, vector<16x128xf32>
    %5 = arith.subf %3, %4 : vector<16x128xf32>
    %c0_4 = arith.constant 0 : index
    %c0_5 = arith.constant 0 : index
    %6 = vector.load %arg4[%c0_4, %c0_5] : memref<8x128xf32, #tpu.memory_space<vmem>>, vector<8x128xf32>
    %7 = arith.mulf %5, %5 : vector<16x128xf32>
    %8 = vector.shape_cast %7 : vector<16x128xf32> to vector<2x8x128xf32>
    %cst = arith.constant dense<0.000000e+00> : vector<8x128xf32>
    %9 = vector.multi_reduction <add>, %8, %cst [0] : vector<2x8x128xf32> to vector<8x128xf32>
    %10 = arith.addf %6, %9 : vector<8x128xf32>
    %c0_6 = arith.constant 0 : index
    %c0_7 = arith.constant 0 : index
    %11 = vector.load %arg4[%c0_6, %c0_7] : memref<8x128xf32, #tpu.memory_space<vmem>>, vector<8x128xf32>
    tpu.vector_store %arg4[%c0_6, %c0_7], %10 {strides = array<i32>} : memref<8x128xf32, #tpu.memory_space<vmem>>, vector<8x128xf32>,
    return
  }
  func.func @transform_0(%arg0: i32, %arg1: i32) -> (i32, i32) {
    %c1_i32 = arith.constant 1 : i32
    %0 = arith.muli %arg0, %c1_i32 : i32
    %1 = arith.addi %0, %arg1 : i32
    %c0_i32 = arith.constant 0 : i32
    %c0_i32_0 = arith.constant 0 : i32
    return %1, %c0_i32 : i32, i32
  }
  func.func @transform_1(%arg0: i32, %arg1: i32) -> (i32, i32) {
    %c1_i32 = arith.constant 1 : i32
    %0 = arith.muli %arg0, %c1_i32 : i32
    %1 = arith.addi %0, %arg1 : i32
    %c0_i32 = arith.constant 0 : i32
    %c0_i32_0 = arith.constant 0 : i32
    return %1, %c0_i32 : i32, i32
  }
  func.func @transform_2(%arg0: i32, %arg1: i32) -> (i32, i32) {
    %c0_i32 = arith.constant 0 : i32
    %c0_i32_0 = arith.constant 0 : i32
    return %arg0, %c0_i32 : i32, i32
  }
}

</mosaic_0001>

<bundles_post_ra>
// kernel: tpu_custom_call.1
= control target key start
LH: loop header
LB: loop body
LE: loop exit
PB: predicated region body
PF: predicated region fallthrough
CT: control target
= control target key end

     0   :  { %7 = vsyncpa [#allocation3], 0  ;;  %s219_s0 = inlined_call_operand.hbm [shape: f32[16,128], index: 0, kind: input, shape index: {}]   ;;  %s220_s1 = inlined_call_operand.hbm [shape: f32[16,128], index: 1, kind: input, shape index: {}]   ;;  %s221_s2 = inlined_call_operand.hbm [shape: f32[8,128], index: 2, kind: output, shape index: {}]  }
   0x1   :  { %8 = vsyncpa [#allocation6], 0 }
   0x2   :  { %9 = vsyncpa [#allocation4], 0  ;;  %s163_s9 = smov [#allocation2]   ;;  %s91_s13 = scalar_lea.hbm %s219_s0, 256 }
   0x3   :  { %s19_s10 = sshll.u32 %s163_s9, 4  ;;  %p92_p0 = scmp.ne.s32.totalorder %s219_s0, %s91_s13  ;;  %s20_s10 = int_to_ptr.vmem [resolvable:$true] %s19_s10 }
   0x4   :  { %p95_p1 = scmp.lt.u32.totalorder %s91_s13, %s219_s0 }
   0x6   :  { %p97_p2 = pnand %p95_p1, %p92_p0 }
   0x8   :  { %100 = shalt.err (!%p97_p2)
}
   0x9   :  { %s101_s18 = scalar_lea.vmem %s20_s10, 256  ;;  %p106_p4 = scmp.lt.s32.totalorder %s20_s10, %s20_s10 }
   0xa   :  { %p102_p3 = scmp.ne.s32.totalorder %s20_s10, %s101_s18  ;;  %p107_p5 = scmp.lt.s32.totalorder %s101_s18, %s101_s18 }
   0xc   :  { %p108_p6 = por %p107_p5, %p106_p4 }
   0xe   :  { %p109_p7 = pnand %p108_p6, %p102_p3 }
  0x10   :  { %112 = shalt.err (!%p109_p7)
}
  0x11   :  { %s164_s19 = smov 128   ;;  %s165_s20 = smov 8  }
  0x12   :  { %25 = dma.hbm_to_vmem [thread:$0]  %s219_s0, 256, %s20_s10, [#allocation3], %s164_s19, %s164_s19, %s165_s20  }
  0x13   :  { %s166_s23 = smov [#allocation5]   ;;  %s113_s27 = scalar_lea.hbm %s220_s1, 256 }
  0x14   :  { %s35_s24 = sshll.u32 %s166_s23, 4  ;;  %p114_p8 = scmp.ne.s32.totalorder %s220_s1, %s113_s27  ;;  %s36_s24 = int_to_ptr.vmem [resolvable:$true] %s35_s24 }
  0x15   :  { %p117_p9 = scmp.lt.u32.totalorder %s113_s27, %s220_s1 }
  0x17   :  { %p119_p10 = pnand %p117_p9, %p114_p8 }
  0x19   :  { %122 = shalt.err (!%p119_p10)
}
  0x1a   :  { %s123_s4 = scalar_lea.vmem %s36_s24, 256  ;;  %p128_p12 = scmp.lt.s32.totalorder %s36_s24, %s36_s24 }
  0x1b   :  { %p124_p11 = scmp.ne.s32.totalorder %s36_s24, %s123_s4  ;;  %p129_p13 = scmp.lt.s32.totalorder %s123_s4, %s123_s4 }
  0x1d   :  { %p130_p0 = por %p129_p13, %p128_p12 }
  0x1f   :  { %p131_p1 = pnand %p130_p0, %p124_p11 }
  0x21   :  { %134 = shalt.err (!%p131_p1)
}
  0x22   :  { %41 = dma.hbm_to_vmem [thread:$0]  %s220_s1, 256, %s36_s24, [#allocation6], %s164_s19, %s164_s19, %s165_s20  }
  0x23   :  { %157 = dma.done.wait [#allocation3], 256  }
  0x24   :  { %158 = vsyncadd [#allocation3], 4294967040 }
  0x25   :  { %159 = dma.done.wait [#allocation6], 256  }
  0x26   :  { %160 = vsyncadd [#allocation6], 4294967040  ;;  %v57_v0 = vld [vmem:[#allocation2] sm:$0xff]  ;;  %v58_v1 = vld [vmem:[#allocation2 + $0x8] sm:$0xff]  ;;  %s167_s6 = smov [#allocation7]  }
  0x27   :  { %v59_v2 = vld [vmem:[#allocation5] sm:$0xff]  ;;  %v60_v3 = vld [vmem:[#allocation5 + $0x8] sm:$0xff]  ;;  %s75_s7 = sshll.u32 %s167_s6, 4  ;;  %s76_s7 = int_to_ptr.vmem [resolvable:$true] %s75_s7 }
  0x28   :  { %v61_v4 = vsub.f32 %v57_v0, %v59_v2  ;;  %v62_v5 = vsub.f32 %v58_v1, %v60_v3  ;;  %s135_s8 = scalar_lea.vmem %s76_s7, 128  ;;  %p140_p3 = scmp.lt.s32.totalorder %s76_s7, %s76_s7 }
  0x29   :  { %p136_p2 = scmp.ne.s32.totalorder %s76_s7, %s135_s8  ;;  %p141_p4 = scmp.lt.s32.totalorder %s135_s8, %s135_s8 }
  0x2a   :  { %v64_v6 = vmul.f32 %v61_v4, %v61_v4  ;;  %v65_v7 = vmul.f32 %v62_v5, %v62_v5 }
  0x2b   :  { %p142_p5 = por %p141_p4, %p140_p3 }
  0x2c   :  { %v66_v8 = vadd.f32 %v65_v7, %v64_v6 }
  0x2d   :  { %p143_p6 = pnand %p142_p5, %p136_p2 }
  0x2e   :  { %68 = vst [vmem:[#allocation7] sm:$0xff] %v66_v8 }
  0x2f   :  { %146 = shalt.err (!%p143_p6)
}
  0x30   :  { %s147_s10 = scalar_lea.hbm %s221_s2, 128 }
  0x31   :  { %p148_p7 = scmp.ne.s32.totalorder %s221_s2, %s147_s10  ;;  %p151_p8 = scmp.lt.u32.totalorder %s147_s10, %s221_s2 }
  0x33   :  { %p153_p9 = pnand %p151_p8, %p148_p7 }
  0x35   :  { %156 = shalt.err (!%p153_p9)
}
  0x36   :  { %78 = dma.vmem_to_hbm [thread:$0]  %s76_s7, 128, %s221_s2, [#allocation4]  }
  0x37   :  { %161 = dma.done.wait [#allocation4], 128  }
  0x38   :  { %162 = vsyncadd [#allocation4], 4294967168 }
  0x39   :  { %82 = vsyncpa [#allocation3], 1 }
  0x3a   :  { %83 = vsyncpa [#allocation6], 1 }
  0x3b   :  { %84 = vsyncpa [#allocation4], 1 }

</bundles_post_ra>
